<compile_context>
chip_gen: v7x
topology: tpu7x:2x2x1
jax: 0.10.0
libtpu: 0.0.40
codegen_flags: <defaults>
</compile_context>

<pallas_src>
import functools
import math

import jax
import jax.numpy as jnp
from jax import lax
from jax.experimental import pallas as pl
from jax.experimental.pallas import tpu as pltpu


_DEFAULT_COMPUTE_DTYPE = jnp.bfloat16
_TM_MAX = 512            # max rows of x per grid step


# ----------------------------- tiling helpers ------------------------------

def _round_up(x, m):
    return (x + m - 1) // m * m


def _sublane_multiple(dtype):
    itemsize = jnp.dtype(dtype).itemsize
    return {1: 32, 2: 16}.get(itemsize, 8)


def _largest_divisor_tile(size, max_tile, multiple):
    """Largest multiple of `multiple` <= max_tile that divides `size` (>= multiple)."""
    best = multiple
    t = multiple
    while t <= min(max_tile, size):
        if size % t == 0:
            best = t
        t += multiple
    return best


@functools.lru_cache(maxsize=None)
def _vmem_limit_bytes():
    """Per-call scoped-VMEM budget derived from the device's physical VMEM."""
    cap = None
    try:
        info = pltpu.get_tpu_info()
        for attr in ("vmem_capacity_bytes", "vmem_size_bytes", "vmem_bytes"):
            v = getattr(info, attr, None)
            if v:
                cap = int(v)
                break
    except Exception:
        cap = None
    if cap is None:
        cap = 64 * 1024 * 1024          # conservative fallback: v7x per-TC VMEM
    return (cap * 3) // 4               # ~48 MiB on v7x, ~96 MiB on v5e/v6e


def _geglu_tiling(dim_in, dim_out, compute_dtype):
    """Tiling shared by pack_geglu_params and geglu: returns (tk, k_pad, tn, n_pad)."""
    dsize = jnp.dtype(compute_dtype).itemsize
    limit = _vmem_limit_bytes()
    budget = int(limit * 0.85)          # headroom inside the scoped-VMEM limit

    # N: pad to a multiple of 128 -> lane-dense (unmasked) output stores.
    n_pad = _round_up(dim_out, 128)

    # K residency: single-K (no accumulator, no weight re-streaming per M tile)
    # whenever full-K tiles fit; threshold scales with dtype and VMEM size.
    if dsize <= 2:
        k_threshold = 8192 if limit >= 80 * 1024 * 1024 else 4096
    else:
        k_threshold = 2048
    if dim_in <= k_threshold:
        tk, k_pad = dim_in, dim_in
    else:
        k_pad = _round_up(dim_in, 128)
        tk_cap = 1024 if dsize <= 2 else 512
        tk = _largest_divisor_tile(k_pad, tk_cap, 128)
    k_tiled = (k_pad // tk) > 1

    def fits(tn):
        tm = _TM_MAX
        x_b = 2 * tm * tk * dsize              # double-buffered x tile
        w_b = 2 * tk * (2 * tn) * dsize        # double-buffered packed-weight tile
        b_b = 2 * (2 * tn) * 4                 # double-buffered bias tile (f32)
        o_b = 2 * tm * tn * 4                  # output tile (worst case f32)
        acc_b = tm * (2 * tn) * 4 if k_tiled else 0
        return x_b + w_b + b_b + o_b + acc_b <= budget

    # Largest tn (multiple of 128 dividing n_pad) that fits the budget; tn == n_pad
    # means the packed weights are fully VMEM-resident (zero x re-reads per N).
    tn = 128
    t = 128
    while t <= n_pad:
        if n_pad % t == 0 and fits(t):
            tn = t
        t += 128
    return tk, k_pad, tn, n_pad


# ------------------------------- kernels -----------------------------------

def _gelu_exact_f32(g):
    # Exact (erf-based) GELU, matching torch.nn.functional.gelu's default.
    inv_sqrt2 = jnp.float32(1.0 / math.sqrt(2.0))
    return 0.5 * g * (1.0 + lax.erf(g * inv_sqrt2))


def _geglu_kernel_single(x_ref, w_ref, b_ref, o_ref):
    # Full K in one step: single fused value|gate matmul, write output directly.
    tn = o_ref.shape[-1]
    p = jnp.dot(x_ref[...], w_ref[...], preferred_element_type=jnp.float32)
    p = p + b_ref[...]
    h, g = p[:, :tn], p[:, tn:]
    o_ref[...] = (h * _gelu_exact_f32(g)).astype(o_ref.dtype)


def _geglu_kernel_ktiled(x_ref, w_ref, b_ref, o_ref, acc_ref):
    k = pl.program_id(2)

    @pl.when(k == 0)
    def _init():
        acc_ref[...] = jnp.zeros_like(acc_ref)

    acc_ref[...] += jnp.dot(x_ref[...], w_ref[...],
                            preferred_element_type=jnp.float32)

    @pl.when(k == pl.num_programs(2) - 1)
    def _finalize():
        tn = o_ref.shape[-1]
        p = acc_ref[...] + b_ref[...]
        h, g = p[:, :tn], p[:, tn:]
        o_ref[...] = (h * _gelu_exact_f32(g)).astype(o_ref.dtype)


# ------------------------------- wrapper ------------------------------------

def pack_geglu_params(weight, bias, *, compute_dtype=_DEFAULT_COMPUTE_DTYPE):
    """One-time packing of nn.Linear-style params (call at init, not per forward).

    weight: (2*dim_out, dim_in), bias: (2*dim_out,)   [torch nn.Linear layout]
    returns
      w_packed: (k_pad, 2*n_pad) in compute_dtype.  Per N strip of width 2*tn,
                the first tn columns are the value half, the next tn the gate
                half (so the kernel runs one fused matmul per step).
      b_packed: (1, 2*n_pad) float32, same interleaving.
    """
    cdt = jnp.dtype(compute_dtype)
    two_dout, dim_in = weight.shape
    dim_out = two_dout // 2
    _, k_pad, tn, n_pad = _geglu_tiling(dim_in, dim_out, cdt)

    w = jnp.asarray(weight)
    b = jnp.asarray(bias).astype(jnp.float32)
    wv, wg = w[:dim_out, :].T, w[dim_out:, :].T      # (K, N) value / gate halves
    bv, bg = b[:dim_out], b[dim_out:]

    if (k_pad, n_pad) != (dim_in, dim_out):
        wv = jnp.pad(wv, ((0, k_pad - dim_in), (0, n_pad - dim_out)))
        wg = jnp.pad(wg, ((0, k_pad - dim_in), (0, n_pad - dim_out)))
        bv = jnp.pad(bv, (0, n_pad - dim_out))
        bg = jnp.pad(bg, (0, n_pad - dim_out))

    ns = n_pad // tn
    w_packed = jnp.stack([wv.reshape(k_pad, ns, tn),
                          wg.reshape(k_pad, ns, tn)], axis=2)
    w_packed = w_packed.reshape(k_pad, 2 * n_pad).astype(cdt)
    b_packed = jnp.stack([bv.reshape(ns, tn),
                          bg.reshape(ns, tn)], axis=1).reshape(1, 2 * n_pad)
    return w_packed, b_packed


def geglu(x, w_packed, b_packed, *, dim_out, compute_dtype=_DEFAULT_COMPUTE_DTYPE):
    """GEGLU forward.  x: (..., dim_in) -> (..., dim_out)."""
    cdt = jnp.dtype(compute_dtype)
    dim_in = x.shape[-1]
    tk, k_pad, tn, n_pad = _geglu_tiling(dim_in, dim_out, cdt)

    assert w_packed.dtype == cdt, (
        f"w_packed dtype {w_packed.dtype} != compute dtype {cdt}; "
        "pack_geglu_params must use the same compute_dtype as geglu.")
    assert w_packed.shape == (k_pad, 2 * n_pad), (w_packed.shape, (k_pad, 2 * n_pad))
    assert b_packed.shape == (1, 2 * n_pad), (b_packed.shape, (1, 2 * n_pad))

    lead_shape = x.shape[:-1]
    m = math.prod(lead_shape) if lead_shape else 1
    out_dtype = x.dtype

    x2d = x.reshape(m, dim_in)
    if x2d.dtype != cdt:
        x2d = x2d.astype(cdt)

    # M tiling: dtype-native sublane multiple; prefer a divisor of m so the
    # wrapper never materializes a padded copy of x through HBM.
    sub = _sublane_multiple(cdt)
    if m <= _TM_MAX:
        tm = _round_up(m, sub)
    elif m % sub == 0:
        tm = _largest_divisor_tile(m, _TM_MAX, sub)
        if tm < 128:                      # degenerate divisor -> accept a pad instead
            tm = _TM_MAX
    else:
        tm = _TM_MAX
    m_pad = _round_up(m, tm)

    # Guarantee >=2 tiles on a "parallel" axis so v7x megacore engages.
    if (n_pad // tn) == 1 and (m_pad // tm) == 1 and tm % (2 * sub) == 0:
        tm //= 2

    if m_pad != m or k_pad != dim_in:
        x2d = jnp.pad(x2d, ((0, m_pad - m), (0, k_pad - dim_in)))

    grid = (n_pad // tn, m_pad // tm, k_pad // tk)
    nk = grid[2]

    if nk == 1:
        kernel = _geglu_kernel_single
        scratch_shapes = ()
    else:
        kernel = _geglu_kernel_ktiled
        scratch_shapes = (pltpu.VMEM((tm, 2 * tn), jnp.float32),)

    out2d = pl.pallas_call(
        kernel,
        out_shape=jax.ShapeDtypeStruct((m_pad, n_pad), out_dtype),
        grid_spec=pltpu.PrefetchScalarGridSpec(
            num_scalar_prefetch=0,
            grid=grid,
            in_specs=[
                # x tile: depends on (m, k); weights stay resident as m advances.
                pl.BlockSpec((tm, tk), lambda ni, mi, ki: (mi, ki)),
                # packed (value|gate) weights: depends on (k, n) only.
                pl.BlockSpec((tk, 2 * tn), lambda ni, mi, ki: (ki, ni)),
                # packed bias: depends on n only.
                pl.BlockSpec((1, 2 * tn), lambda ni, mi, ki: (0, ni)),
            ],
            out_specs=pl.BlockSpec((tm, tn), lambda ni, mi, ki: (mi, ni)),
            scratch_shapes=scratch_shapes,
        ),
        compiler_params=pltpu.CompilerParams(
            dimension_semantics=("parallel", "parallel", "arbitrary"),
            vmem_limit_bytes=_vmem_limit_bytes(),
        ),
    )(x2d, w_packed, b_packed)

    out2d = out2d[:m, :dim_out]
    return out2d.reshape(*lead_shape, dim_out)


# --------------------------------- demo --------------------------------------

def _reference(x, weight, bias, dim_out):
    proj = x @ weight.T + bias
    h, g = proj[..., :dim_out], proj[..., dim_out:]
    return h * (0.5 * g * (1.0 + lax.erf(g * jnp.float32(1.0 / math.sqrt(2.0)))))


def _bf16_round(a):
    return a.astype(jnp.bfloat16).astype(jnp.float32)


if __name__ == "__main__":
    key = jax.random.PRNGKey(0)

    # --- primary check: small shapes consistent with the module (bf16 path) ---
    batch, seq, dim_in, dim_out = 2, 8, 32, 32
    kx, kw, kb, key = jax.random.split(key, 4)
    x = jax.random.normal(kx, (batch, seq, dim_in), dtype=jnp.float32)
    bound = 1.0 / math.sqrt(dim_in)
    weight = jax.random.uniform(kw, (2 * dim_out, dim_in),
                                minval=-bound, maxval=bound, dtype=jnp.float32)
    bias = jax.random.uniform(kb, (2 * dim_out,),
                              minval=-bound, maxval=bound, dtype=jnp.float32)

    w_packed, b_packed = pack_geglu_params(weight, bias)          # bf16 default
    out = geglu(x, w_packed, b_packed, dim_out=dim_out)
    jax.block_until_ready(out)

    ref = _reference(_bf16_round(x), _bf16_round(weight), bias, dim_out)
    assert out.shape == (batch, seq, dim_out)
    assert out.dtype == x.dtype
    assert jnp.allclose(out, ref, atol=2e-3, rtol=2e-3), float(jnp.max(jnp.abs(out - ref)))

    # --- uneven shapes: exercises M / N padding + slicing (bf16 path) ---------
    b2, s2, di2, do2 = 2, 7, 48, 40
    kx, kw, kb, key = jax.random.split(key, 4)
    x2 = jax.random.normal(kx, (b2, s2, di2), dtype=jnp.float32)
    bnd2 = 1.0 / math.sqrt(di2)
    w2 = jax.random.uniform(kw, (2 * do2, di2), minval=-bnd2, maxval=bnd2, dtype=jnp.float32)
    bb2 = jax.random.uniform(kb, (2 * do2,), minval=-bnd2, maxval=bnd2, dtype=jnp.float32)
    wp2, bp2 = pack_geglu_params(w2, bb2)
    out2 = geglu(x2, wp2, bp2, dim_out=do2)
    jax.block_until_ready(out2)
    ref2 = _reference(_bf16_round(x2), _bf16_round(w2), bb2, do2)
    assert out2.shape == (b2, s2, do2)
    assert jnp.allclose(out2, ref2, atol=2e-3, rtol=2e-3), float(jnp.max(jnp.abs(out2 - ref2)))

    # --- wide dim_in with f32 fallback: exercises the K-tiled accumulator -----
    b3, s3, di3, do3 = 2, 8, 2304, 64
    kx, kw, kb, key = jax.random.split(key, 4)
    x3 = jax.random.normal(kx, (b3, s3, di3), dtype=jnp.float32)
    bnd3 = 1.0 / math.sqrt(di3)
    w3 = jax.random.uniform(kw, (2 * do3, di3), minval=-bnd3, maxval=bnd3, dtype=jnp.float32)
    bb3 = jax.random.uniform(kb, (2 * do3,), minval=-bnd3, maxval=bnd3, dtype=jnp.float32)
    wp3, bp3 = pack_geglu_params(w3, bb3, compute_dtype=jnp.float32)
    out3 = geglu(x3, wp3, bp3, dim_out=do3, compute_dtype=jnp.float32)
    jax.block_until_ready(out3)
    ref3 = _reference(x3, w3, bb3, do3)
    assert out3.shape == (b3, s3, do3)
    assert jnp.allclose(out3, ref3, atol=2e-3, rtol=2e-3), float(jnp.max(jnp.abs(out3 - ref3)))

    print("KERNEL_OK")
</pallas_src>

<mosaic_0001>
module attributes {stable_mosaic.version = 11 : i64} {
  func.func @_geglu_kernel_single(%arg0: i32, %arg1: i32, %arg2: i32, %arg3: memref<16x32xbf16, #tpu.memory_space<vmem>>, %arg4: memref<32x256xbf16, #tpu.memory_space<vmem>>, %arg5: memref<1x256xf32, #tpu.memory_space<vmem>>, %arg6: memref<16x128xf32, #tpu.memory_space<vmem>>) attributes {dimension_semantics = [#tpu.dimension_semantics<parallel>, #tpu.dimension_semantics<parallel>, #tpu.dimension_semantics<arbitrary>], iteration_bounds = array<i64: 1, 1, 1>, scalar_prefetch = 0 : i64, scratch_operands = 0 : i64, tpu.core_type = #tpu.core_type<tc>, window_params = [{transform_indices = @transform_0, window_bounds = array<i64: 16, 32>}, {transform_indices = @transform_1, window_bounds = array<i64: 32, 256>}, {transform_indices = @transform_2, window_bounds = array<i64: 1, 256>}, {transform_indices = @transform_3, window_bounds = array<i64: 16, 128>}]} {
    %c0 = arith.constant 0 : index
    %c0_0 = arith.constant 0 : index
    %0 = vector.load %arg3[%c0, %c0_0] : memref<16x32xbf16, #tpu.memory_space<vmem>>, vector<16x32xbf16>
    %c0_1 = arith.constant 0 : index
    %c0_2 = arith.constant 0 : index
    %1 = vector.load %arg4[%c0_1, %c0_2] : memref<32x256xbf16, #tpu.memory_space<vmem>>, vector<32x256xbf16>
    %cst = arith.constant dense<0.000000e+00> : vector<16x256xf32>
    %2 = tpu.matmul %0, %1, %cst {dimension_numbers = #tpu.dot_dimension_numbers<[1], [0], [0], [1], [0, 0, 1, 1], [], []>} : vector<16x32xbf16>, vector<32x256xbf16>, vector<16x256xf32> -> vector<16x256xf32>
    %c0_3 = arith.constant 0 : index
    %c0_4 = arith.constant 0 : index
    %3 = vector.load %arg5[%c0_3, %c0_4] : memref<1x256xf32, #tpu.memory_space<vmem>>, vector<1x256xf32>
    %4 = vector.broadcast %3 : vector<1x256xf32> to vector<16x256xf32>
    %5 = arith.addf %2, %4 : vector<16x256xf32>
    %6 = vector.extract_strided_slice %5 {offsets = [0, 0], sizes = [16, 128], strides = [1, 1]} : vector<16x256xf32> to vector<16x128xf32>
    %7 = vector.extract_strided_slice %5 {offsets = [0, 128], sizes = [16, 128], strides = [1, 1]} : vector<16x256xf32> to vector<16x128xf32>
    %cst_5 = arith.constant 5.000000e-01 : f32
    %8 = vector.broadcast %cst_5 : f32 to vector<16x128xf32>
    %9 = arith.mulf %8, %7 : vector<16x128xf32>
    %cst_6 = arith.constant 0.707106769 : f32
    %10 = vector.broadcast %cst_6 : f32 to vector<16x128xf32>
    %11 = arith.mulf %7, %10 : vector<16x128xf32>
    %12 = math.erf %11 : vector<16x128xf32>
    %cst_7 = arith.constant 1.000000e+00 : f32
    %13 = vector.broadcast %cst_7 : f32 to vector<16x128xf32>
    %14 = arith.addf %13, %12 : vector<16x128xf32>
    %15 = arith.mulf %9, %14 : vector<16x128xf32>
    %16 = arith.mulf %6, %15 : vector<16x128xf32>
    %c0_8 = arith.constant 0 : index
    %c0_9 = arith.constant 0 : index
    %17 = vector.load %arg6[%c0_8, %c0_9] : memref<16x128xf32, #tpu.memory_space<vmem>>, vector<16x128xf32>
    tpu.vector_store %arg6[%c0_8, %c0_9], %16 {strides = array<i32>} : memref<16x128xf32, #tpu.memory_space<vmem>>, vector<16x128xf32>,
    return
  }
  func.func @transform_0(%arg0: i32, %arg1: i32, %arg2: i32) -> (i32, i32) {
    %c0_i32 = arith.constant 0 : i32
    return %arg1, %arg2 : i32, i32
  }
  func.func @transform_1(%arg0: i32, %arg1: i32, %arg2: i32) -> (i32, i32) {
    %c0_i32 = arith.constant 0 : i32
    return %arg2, %arg0 : i32, i32
  }
  func.func @transform_2(%arg0: i32, %arg1: i32, %arg2: i32) -> (i32, i32) {
    %c0_i32 = arith.constant 0 : i32
    %c0_i32_0 = arith.constant 0 : i32
    return %c0_i32, %arg0 : i32, i32
  }
  func.func @transform_3(%arg0: i32, %arg1: i32, %arg2: i32) -> (i32, i32) {
    %c0_i32 = arith.constant 0 : i32
    return %arg1, %arg0 : i32, i32
  }
}

</mosaic_0001>

<bundles_post_ra>
// kernel: tpu_custom_call.1
= control target key start
LH: loop header
LB: loop body
LE: loop exit
PB: predicated region body
PF: predicated region fallthrough
CT: control target
= control target key end

     0   :  { %8 = vsyncpa [#allocation3], 0  ;;  %s336_s0 = inlined_call_operand.hbm [shape: bf16[16,32], index: 0, kind: input, shape index: {}]   ;;  %s337_s1 = inlined_call_operand.hbm [shape: bf16[32,256], index: 1, kind: input, shape index: {}]   ;;  %s338_s2 = inlined_call_operand.vmem [shape: f32[1,256], index: 2, kind: input, shape index: {}]   ;;  %s339_s3 = inlined_call_operand.hbm [shape: f32[16,128], index: 3, kind: output, shape index: {}]  }
   0x1   :  { %9 = vsyncpa [#allocation6], 0 }
   0x2   :  { %10 = vsyncpa [#allocation4], 0  ;;  %s263_s12 = smov [#allocation2]   ;;  %s191_s16 = scalar_lea.hbm %s336_s0, 128 }
   0x3   :  { %s16_s13 = sshll.u32 %s263_s12, 4  ;;  %p192_p0 = scmp.ne.s32.totalorder %s336_s0, %s191_s16  ;;  %s17_s13 = int_to_ptr.vmem [resolvable:$true] %s16_s13 }
   0x4   :  { %p195_p1 = scmp.lt.u32.totalorder %s191_s16, %s336_s0 }
   0x6   :  { %p197_p2 = pnand %p195_p1, %p192_p0 }
   0x8   :  { %200 = shalt.err (!%p197_p2)
}
   0x9   :  { %s201_s21 = scalar_lea.vmem %s17_s13, 128  ;;  %p206_p4 = scmp.lt.s32.totalorder %s17_s13, %s17_s13 }
   0xa   :  { %p202_p3 = scmp.ne.s32.totalorder %s17_s13, %s201_s21  ;;  %p207_p5 = scmp.lt.s32.totalorder %s201_s21, %s201_s21 }
   0xc   :  { %p208_p6 = por %p207_p5, %p206_p4 }
   0xe   :  { %p209_p7 = pnand %p208_p6, %p202_p3 }
  0x10   :  { %212 = shalt.err (!%p209_p7)
}
  0x11   :  { %s264_s22 = smov 64   ;;  %s265_s23 = smov 4  }
  0x12   :  { %22 = dma.hbm_to_vmem [thread:$0]  %s336_s0, 128, %s17_s13, [#allocation3], %s264_s22, %s264_s22, %s265_s23  }
  0x13   :  { %s266_s26 = smov [#allocation5]   ;;  %s213_s30 = scalar_lea.hbm %s337_s1, 512 }
  0x14   :  { %s28_s27 = sshll.u32 %s266_s26, 4  ;;  %p214_p8 = scmp.ne.s32.totalorder %s337_s1, %s213_s30  ;;  %s29_s27 = int_to_ptr.vmem [resolvable:$true] %s28_s27 }
  0x15   :  { %p217_p9 = scmp.lt.u32.totalorder %s213_s30, %s337_s1 }
  0x17   :  { %p219_p10 = pnand %p217_p9, %p214_p8 }
  0x19   :  { %222 = shalt.err (!%p219_p10)
}
  0x1a   :  { %s223_s8 = scalar_lea.vmem %s29_s27, 512  ;;  %p228_p12 = scmp.lt.s32.totalorder %s29_s27, %s29_s27 }
  0x1b   :  { %p224_p11 = scmp.ne.s32.totalorder %s29_s27, %s223_s8  ;;  %p229_p13 = scmp.lt.s32.totalorder %s223_s8, %s223_s8 }
  0x1d   :  { %p230_p0 = por %p229_p13, %p228_p12 }
  0x1f   :  { %p231_p1 = pnand %p230_p0, %p224_p11 }
  0x21   :  { %234 = shalt.err (!%p231_p1)
}
  0x22   :  { %s267_s0 = smov 128   ;;  %s268_s9 = smov 8  }
  0x23   :  { %34 = dma.hbm_to_vmem [thread:$0]  %s337_s1, 512, %s29_s27, [#allocation6], %s267_s0, %s267_s0, %s268_s9  }
  0x24   :  { %257 = dma.done.wait [#allocation3], 128  }
  0x25   :  { %258 = vsyncadd [#allocation3], 4294967168 }
  0x26   :  { %259 = dma.done.wait [#allocation6], 512  }
  0x27   :  { %260 = vsyncadd [#allocation6], 4294966784  ;;  %v269_v0 = vmov 0   ;;  %v180_v1 = vld [vmem:[#allocation5 + $0x4] ss:$8 sps:$4 sm:$0xff]   ;;  %v186_v5 = vld [vmem:[#allocation2] sm:$0xff]   ;;  %v52_v6 = vlaneseq }
  0x28   :  { %123 = vmatprep.mubr.bf16.mxu0 %v269_v0  ;;  %v182_v2 = vld [vmem:[#allocation5] ss:$8 sps:$4 sm:$0xff]   ;;  %91 = vmatprep.subr.bf16.mxu0 %v180_v1  ;;  %v183_v3 = vld [vmem:[#allocation5 + $0x14] ss:$8 sps:$4 sm:$0xff]   ;;  %v185_v4 = vld [vmem:[#allocation5 + $0x10] ss:$8 sps:$4 sm:$0xff]  }
  0x29   :  { %92 = vmatpush1.bf16.msra.mxu0 %v182_v2  ;;  %vm87_vm0 = vcmask 261120   ;;  %v53_v7 = vshrl.u32 %v52_v6, 7  ;;  %v50_v9 = vld [vmem:[%s338_s2] sm:$0x3]  ;;  %s270_s2 = smov [#allocation7]  }
  0x2a   :  { %93 = vmatprep.subr.bf16.mxu0 %v183_v3  ;;  %s153_s13 = sshll.u32 %s270_s2, 4  ;;  %s154_s13 = int_to_ptr.vmem [resolvable:$true] %s153_s13 }
  0x2b   :  { %v58_v8 = vsub.s32 1, %v53_v7  ;;  %v54_v19 = vsub.s32 0, %v53_v7  ;;  %s235_s14 = scalar_lea.vmem %s154_s13, 256  ;;  %p240_p3 = scmp.lt.s32.totalorder %s154_s13, %s154_s13 }
  0x2c   :  { %p236_p2 = scmp.ne.s32.totalorder %s154_s13, %s235_s14  ;;  %p241_p4 = scmp.lt.s32.totalorder %s235_s14, %s235_s14 }
  0x2d   :  { %94 = vmatpush1.bf16.msra.mxu0 %v185_v4  ;;  %v59_v10 = vrot.slane %v50_v9, %v58_v8  ;;  %v55_v20 = vrot.slane %v50_v9, %v54_v19 }
  0x2e   :  { %p242_p5 = por %p241_p4, %p240_p3 }
  0x30   :  { %171 = vmatmul.mubr.msk.bf16.vlgmr.msra.gmra.mrb[0].mxu0 %vm87_vm0, %v186_v5  ;;  %p243_p6 = pnand %p242_p5, %p236_p2 }
 0x103   :  { %v125_v11 = vpop.f32.mrb[0].mxu0 }
 0x104   :  { %v127_v12 = vpop.f32.mrb[1].mxu0  ;;  %v126_v25 = vadd.f32 %v125_v11, %v55_v20 }
 0x105   :  { %v128_v13 = vadd.f32 %v127_v12, %v59_v10  ;;  %v129_v14 = vpop.f32.mrb[2].mxu0 }
 0x106   :  { %v131_v15 = vpop.f32.mrb[3].mxu0  ;;  %v130_v29 = vadd.f32 %v129_v14, %v55_v20 }
 0x107   :  { %v136_v16 = vmul.f32 0.70710677, %v128_v13  ;;  %v132_v17 = vadd.f32 %v131_v15, %v59_v10  ;;  %v134_v22 = vmul.f32 0.5, %v128_v13 }
 0x109   :  { %187 = verf.f32 %v136_v16  ;;  %v137_v18 = vmul.f32 0.70710677, %v132_v17  ;;  %v135_v27 = vmul.f32 0.5, %v132_v17 }
 0x10b   :  { %189 = verf.f32 %v137_v18 }
 0x113   :  { %v188_v21 = vpop.eup %187 }
 0x114   :  { %v140_v23 = vadd.f32 1.0, %v188_v21 }
 0x115   :  { %v190_v24 = vpop.eup %189 }
 0x116   :  { %v142_v26 = vmul.f32 %v140_v23, %v134_v22  ;;  %v141_v28 = vadd.f32 1.0, %v190_v24 }
 0x118   :  { %v143_v30 = vmul.f32 %v141_v28, %v135_v27  ;;  %v144_v31 = vmul.f32 %v142_v26, %v126_v25 }
 0x11a   :  { %v145_v32 = vmul.f32 %v143_v30, %v130_v29  ;;  %146 = vst [vmem:[#allocation7] sm:$0xff] %v144_v31 }
 0x11c   :  { %147 = vst [vmem:[#allocation7 + $0x8] sm:$0xff] %v145_v32 }
 0x11d   :  { %246 = shalt.err (!%p243_p6)
}
 0x11e   :  { %s247_s17 = scalar_lea.hbm %s339_s3, 256 }
 0x11f   :  { %p248_p7 = scmp.ne.s32.totalorder %s339_s3, %s247_s17  ;;  %p251_p8 = scmp.lt.u32.totalorder %s247_s17, %s339_s3 }
 0x121   :  { %p253_p9 = pnand %p251_p8, %p248_p7 }
 0x123   :  { %256 = shalt.err (!%p253_p9)
}
 0x124   :  { %159 = dma.vmem_to_hbm [thread:$0]  %s154_s13, 256, %s339_s3, [#allocation4], %s267_s0, %s267_s0, %s268_s9  }
 0x125   :  { %261 = dma.done.wait [#allocation4], 256  }
 0x126   :  { %262 = vsyncadd [#allocation4], 4294967040 }
 0x127   :  { %163 = vsyncpa [#allocation3], 1 }
 0x128   :  { %164 = vsyncpa [#allocation6], 1 }
 0x129   :  { %165 = vsyncpa [#allocation4], 1 }

</bundles_post_ra>
